<compile_context>
chip_gen: v7x
topology: tpu7x:2x2x1
jax: 0.10.0
libtpu: 0.0.40
codegen_flags: <defaults>
</compile_context>

<pallas_src>
import functools

import jax
import jax.numpy as jnp
from jax.experimental import pallas as pl
from jax.experimental.pallas import tpu as pltpu


def _l1_loss_kernel(feat_ref, ind_ref, mask_ref, target_ref, out_ref, acc_ref,
                    *, hw_tile):
    # feat_ref   : (1, T_HW, C) f32   VMEM   (one HW tile of the feature map)
    # ind_ref    : (1, 1,  K)   i32   VMEM
    # mask_ref   : (1, 1,  K)   f32   VMEM
    # target_ref : (1, C,  K)   f32   VMEM   (pre-transposed, K on lanes)
    # out_ref    : (1, 1, 128)  f32   VMEM   (per-batch partial L1 sum, bcast on lanes)
    # acc_ref    : (C, K)       f32   VMEM scratch (gathered pred, acc. over HW tiles)
    h = pl.program_id(1)

    @pl.when(h == 0)
    def _():
        acc_ref[...] = jnp.zeros_like(acc_ref)

    feat = feat_ref[0]                       # (T_HW, C)
    ind_row = ind_ref[0]                     # (1, K) int32

    t_hw, _ = feat.shape
    k = ind_row.shape[1]

    # Rows of this HW tile cover flat indices [h*T_HW, (h+1)*T_HW).
    # one_hot[s, k] = (h*T_HW + s == ind[k]); K sits on the lane axis.
    iota_sk = jax.lax.broadcasted_iota(jnp.int32, (t_hw, k), 0) + h * hw_tile
    one_hot = (iota_sk == ind_row).astype(feat.dtype)                   # (T_HW, K)

    # Partial gather on the MXU: pred_part[c, k] = sum_s feat[s, c] * one_hot[s, k]
    acc_ref[...] += jax.lax.dot_general(
        feat, one_hot, (((0,), (0,)), ((), ())),
        preferred_element_type=jnp.float32)                             # (C, K)

    @pl.when(h == pl.num_programs(1) - 1)
    def _():
        m = mask_ref[0]                                                 # (1, K), bcast over sublanes
        diff = acc_ref[...] * m - target_ref[0] * m                     # (C, K)
        partial = jnp.sum(jnp.abs(diff))
        # Lane-dense store of the per-batch partial sum.
        out_ref[...] = jnp.broadcast_to(partial, out_ref.shape).astype(jnp.float32)


def _pick_hw_tile(hw, max_tile=512):
    if hw <= max_tile:
        return hw
    for t in (512, 256, 128, 64, 32, 16, 8):
        if t <= max_tile and hw % t == 0:
            return t
    return hw


def l1_loss_pallas(output, mask, ind, target, *, hw_tile=None):
    """output: (B,C,H,W), mask: (B,K), ind: (B,K) int, target: (B,K,C)."""
    B, C, H, W = output.shape
    K = ind.shape[1]
    HW = H * W

    feat = jnp.transpose(output.astype(jnp.float32), (0, 2, 3, 1)).reshape(B, HW, C)
    ind3 = ind.astype(jnp.int32).reshape(B, 1, K)
    mask3 = mask.astype(jnp.float32).reshape(B, 1, K)
    target_t = jnp.transpose(target.astype(jnp.float32), (0, 2, 1))     # (B, C, K)

    if hw_tile is None:
        hw_tile = _pick_hw_tile(HW)
    assert HW % hw_tile == 0, (HW, hw_tile)
    n_hw = HW // hw_tile

    kernel = functools.partial(_l1_loss_kernel, hw_tile=hw_tile)

    partials = pl.pallas_call(
        kernel,
        out_shape=jax.ShapeDtypeStruct((B, 1, 128), jnp.float32),
        grid_spec=pltpu.PrefetchScalarGridSpec(
            num_scalar_prefetch=0,
            grid=(B, n_hw),
            in_specs=[
                pl.BlockSpec((1, hw_tile, C), lambda b, h: (b, h, 0)),
                pl.BlockSpec((1, 1, K), lambda b, h: (b, 0, 0)),
                pl.BlockSpec((1, 1, K), lambda b, h: (b, 0, 0)),
                pl.BlockSpec((1, C, K), lambda b, h: (b, 0, 0)),
            ],
            out_specs=pl.BlockSpec((1, 1, 128), lambda b, h: (b, 0, 0)),
            scratch_shapes=[pltpu.VMEM((C, K), jnp.float32)],
        ),
        compiler_params=pltpu.CompilerParams(
            # batch axis parallel (megacore / v7x 2-TC), HW reduction arbitrary
            dimension_semantics=("parallel", "arbitrary"),
            vmem_limit_bytes=32 * 1024 * 1024,
        ),
    )(feat, ind3, mask3, target_t)

    # reduction='mean' in F.l1_loss divides by the full element count B*K*C.
    return jnp.sum(partials[:, 0, 0]) / jnp.float32(B * K * C)


def _l1_loss_reference(output, mask, ind, target):
    B, C, H, W = output.shape
    feat = jnp.transpose(output, (0, 2, 3, 1)).reshape(B, H * W, C)
    pred = jnp.take_along_axis(feat, ind[:, :, None].astype(jnp.int32), axis=1)
    m = mask.astype(jnp.float32)[:, :, None]
    return jnp.mean(jnp.abs(pred * m - target * m))


if __name__ == "__main__":
    B, C, H, W, K = 2, 4, 16, 16, 8

    key = jax.random.PRNGKey(0)
    k1, k2, k3, k4 = jax.random.split(key, 4)
    output = jax.random.normal(k1, (B, C, H, W), dtype=jnp.float32)
    ind = jax.random.randint(k2, (B, K), 0, H * W, dtype=jnp.int32)
    mask = jax.random.randint(k3, (B, K), 0, 2, dtype=jnp.int32)  # binary mask
    target = jax.random.normal(k4, (B, K, C), dtype=jnp.float32)

    # hw_tile=128 -> 2 HW steps per batch, exercising the tiled accumulation path.
    loss = jax.block_until_ready(l1_loss_pallas(output, mask, ind, target, hw_tile=128))
    ref = jax.block_until_ready(_l1_loss_reference(output, mask, ind, target))

    assert jnp.allclose(loss, ref, rtol=1e-5, atol=1e-6), (loss, ref)
    print("KERNEL_OK")
</pallas_src>

<mosaic_0001>
module attributes {stable_mosaic.version = 11 : i64} {
  func.func @_l1_loss_kernel(%arg0: i32, %arg1: i32, %arg2: memref<1x128x4xf32, #tpu.memory_space<vmem>>, %arg3: memref<1x1x8xi32, #tpu.memory_space<vmem>>, %arg4: memref<1x1x8xf32, #tpu.memory_space<vmem>>, %arg5: memref<1x4x8xf32, #tpu.memory_space<vmem>>, %arg6: memref<1x1x128xf32, #tpu.memory_space<vmem>>, %arg7: memref<4x8xf32, #tpu.memory_space<vmem>>) attributes {dimension_semantics = [#tpu.dimension_semantics<parallel>, #tpu.dimension_semantics<arbitrary>], iteration_bounds = array<i64: 2, 2>, scalar_prefetch = 0 : i64, scratch_operands = 1 : i64, tpu.core_type = #tpu.core_type<tc>, window_params = [{transform_indices = @transform_0, window_bounds = array<i64: 1, 128, 4>}, {transform_indices = @transform_1, window_bounds = array<i64: 1, 1, 8>}, {transform_indices = @transform_2, window_bounds = array<i64: 1, 1, 8>}, {transform_indices = @transform_3, window_bounds = array<i64: 1, 4, 8>}, {transform_indices = @transform_4, window_bounds = array<i64: 1, 1, 128>}]} {
    %c0_i32 = arith.constant 0 : i32
    %0 = arith.cmpi eq, %arg1, %c0_i32 : i32
    %1 = arith.extui %0 : i1 to i32
    %c0_i32_0 = arith.constant 0 : i32
    %2 = arith.cmpi ne, %1, %c0_i32_0 : i32
    scf.if %2 {
      %cst_11 = arith.constant 0.000000e+00 : f32
      %22 = vector.broadcast %cst_11 : f32 to vector<4x8xf32>
      %c0_12 = arith.constant 0 : index
      %c0_13 = arith.constant 0 : index
      %23 = vector.load %arg7[%c0_12, %c0_13] : memref<4x8xf32, #tpu.memory_space<vmem>>, vector<4x8xf32>
      tpu.vector_store %arg7[%c0_12, %c0_13], %22 {strides = array<i32>} : memref<4x8xf32, #tpu.memory_space<vmem>>, vector<4x8xf32>,
    } else {
    }
    %c0 = arith.constant 0 : index
    %c0_1 = arith.constant 0 : index
    %c0_2 = arith.constant 0 : index
    %3 = vector.load %arg2[%c0, %c0_1, %c0_2] : memref<1x128x4xf32, #tpu.memory_space<vmem>>, vector<1x128x4xf32>
    %4 = vector.shape_cast %3 : vector<1x128x4xf32> to vector<128x4xf32>
    %c0_3 = arith.constant 0 : index
    %c0_4 = arith.constant 0 : index
    %c0_5 = arith.constant 0 : index
    %5 = vector.load %arg3[%c0_3, %c0_4, %c0_5] : memref<1x1x8xi32, #tpu.memory_space<vmem>>, vector<1x1x8xi32>
    %6 = vector.shape_cast %5 : vector<1x1x8xi32> to vector<1x8xi32>
    %7 = tpu.iota {dimensions = array<i32: 0>} : vector<128x8xi32>
    %c128_i32 = arith.constant 128 : i32
    %8 = arith.muli %arg1, %c128_i32 : i32
    %9 = vector.broadcast %8 : i32 to vector<128x8xi32>
    %10 = arith.addi %7, %9 : vector<128x8xi32>
    %11 = vector.broadcast %6 : vector<1x8xi32> to vector<128x8xi32>
    %12 = arith.cmpi eq, %10, %11 : vector<128x8xi32>
    %13 = arith.extui %12 : vector<128x8xi1> to vector<128x8xi32>
    %14 = arith.sitofp %13 : vector<128x8xi32> to vector<128x8xf32>
    %c0_6 = arith.constant 0 : index
    %c0_7 = arith.constant 0 : index
    %15 = vector.load %arg7[%c0_6, %c0_7] : memref<4x8xf32, #tpu.memory_space<vmem>>, vector<4x8xf32>
    %cst = arith.constant dense<0.000000e+00> : vector<4x8xf32>
    %16 = tpu.matmul %4, %14, %cst {dimension_numbers = #tpu.dot_dimension_numbers<[0], [0], [1], [1], [0, 1, 1, 1], [], []>} : vector<128x4xf32>, vector<128x8xf32>, vector<4x8xf32> -> vector<4x8xf32>
    %17 = arith.addf %15, %16 : vector<4x8xf32>
    %c0_8 = arith.constant 0 : index
    %c0_9 = arith.constant 0 : index
    %18 = vector.load %arg7[%c0_8, %c0_9] : memref<4x8xf32, #tpu.memory_space<vmem>>, vector<4x8xf32>
    tpu.vector_store %arg7[%c0_8, %c0_9], %17 {strides = array<i32>} : memref<4x8xf32, #tpu.memory_space<vmem>>, vector<4x8xf32>,
    %c1_i32 = arith.constant 1 : i32
    %19 = arith.cmpi eq, %arg1, %c1_i32 : i32
    %20 = arith.extui %19 : i1 to i32
    %c0_i32_10 = arith.constant 0 : i32
    %21 = arith.cmpi ne, %20, %c0_i32_10 : i32
    scf.if %21 {
      %c0_11 = arith.constant 0 : index
      %c0_12 = arith.constant 0 : index
      %c0_13 = arith.constant 0 : index
      %22 = vector.load %arg4[%c0_11, %c0_12, %c0_13] : memref<1x1x8xf32, #tpu.memory_space<vmem>>, vector<1x1x8xf32>
      %23 = vector.shape_cast %22 : vector<1x1x8xf32> to vector<1x8xf32>
      %c0_14 = arith.constant 0 : index
      %c0_15 = arith.constant 0 : index
      %24 = vector.load %arg7[%c0_14, %c0_15] : memref<4x8xf32, #tpu.memory_space<vmem>>, vector<4x8xf32>
      %25 = vector.broadcast %23 : vector<1x8xf32> to vector<4x8xf32>
      %26 = arith.mulf %24, %25 : vector<4x8xf32>
      %c0_16 = arith.constant 0 : index
      %c0_17 = arith.constant 0 : index
      %c0_18 = arith.constant 0 : index
      %27 = vector.load %arg5[%c0_16, %c0_17, %c0_18] : memref<1x4x8xf32, #tpu.memory_space<vmem>>, vector<1x4x8xf32>
      %28 = vector.shape_cast %27 : vector<1x4x8xf32> to vector<4x8xf32>
      %29 = vector.broadcast %23 : vector<1x8xf32> to vector<4x8xf32>
      %30 = arith.mulf %28, %29 : vector<4x8xf32>
      %31 = arith.subf %26, %30 : vector<4x8xf32>
      %32 = math.absf %31 : vector<4x8xf32>
      %33 = vector.shape_cast %32 : vector<4x8xf32> to vector<1x4x8xf32>
      %cst_19 = arith.constant dense<0.000000e+00> : vector<1xf32>
      %34 = vector.multi_reduction <add>, %33, %cst_19 [1, 2] : vector<1x4x8xf32> to vector<1xf32>
      %35 = vector.shape_cast %34 : vector<1xf32> to vector<1x1x1xf32>
      %36 = vector.extract %35[0, 0, 0] : f32 from vector<1x1x1xf32>
      %37 = vector.broadcast %36 : f32 to vector<1x1x128xf32>
      %c0_20 = arith.constant 0 : index
      %c0_21 = arith.constant 0 : index
      %c0_22 = arith.constant 0 : index
      %38 = vector.load %arg6[%c0_20, %c0_21, %c0_22] : memref<1x1x128xf32, #tpu.memory_space<vmem>>, vector<1x1x128xf32>
      tpu.vector_store %arg6[%c0_20, %c0_21, %c0_22], %37 {strides = array<i32>} : memref<1x1x128xf32, #tpu.memory_space<vmem>>, vector<1x1x128xf32>,
    } else {
    }
    return
  }
  func.func @transform_0(%arg0: i32, %arg1: i32) -> (i32, i32, i32) {
    %c0_i32 = arith.constant 0 : i32
    %c0_i32_0 = arith.constant 0 : i32
    return %arg0, %arg1, %c0_i32 : i32, i32, i32
  }
  func.func @transform_1(%arg0: i32, %arg1: i32) -> (i32, i32, i32) {
    %c0_i32 = arith.constant 0 : i32
    %c0_i32_0 = arith.constant 0 : i32
    %c0_i32_1 = arith.constant 0 : i32
    return %arg0, %c0_i32, %c0_i32_0 : i32, i32, i32
  }
  func.func @transform_2(%arg0: i32, %arg1: i32) -> (i32, i32, i32) {
    %c0_i32 = arith.constant 0 : i32
    %c0_i32_0 = arith.constant 0 : i32
    %c0_i32_1 = arith.constant 0 : i32
    return %arg0, %c0_i32, %c0_i32_0 : i32, i32, i32
  }
  func.func @transform_3(%arg0: i32, %arg1: i32) -> (i32, i32, i32) {
    %c0_i32 = arith.constant 0 : i32
    %c0_i32_0 = arith.constant 0 : i32
    %c0_i32_1 = arith.constant 0 : i32
    return %arg0, %c0_i32, %c0_i32_0 : i32, i32, i32
  }
  func.func @transform_4(%arg0: i32, %arg1: i32) -> (i32, i32, i32) {
    %c0_i32 = arith.constant 0 : i32
    %c0_i32_0 = arith.constant 0 : i32
    %c0_i32_1 = arith.constant 0 : i32
    return %arg0, %c0_i32, %c0_i32_0 : i32, i32, i32
  }
}

</mosaic_0001>

<bundles_post_ra>
// kernel: tpu_custom_call.1
= control target key start
LH: loop header
LB: loop body
LE: loop exit
PB: predicated region body
PF: predicated region fallthrough
CT: control target
= control target key end

     0   :  { %9 = vsyncpa [#allocation4], 0  ;;  %s1212_s0 = inlined_call_operand.vmem [shape: f32[2,256,4], index: 0, kind: input, shape index: {}]   ;;  %s1213_s1 = inlined_call_operand.vmem [shape: s32[2,1,8], index: 1, kind: input, shape index: {}]   ;;  %s1214_s2 = inlined_call_operand.vmem [shape: f32[2,1,8], index: 2, kind: input, shape index: {}]   ;;  %s1215_s3 = inlined_call_operand.vmem [shape: f32[2,4,8], index: 3, kind: input, shape index: {}]   ;;  %s1216_s4 = inlined_call_operand.hbm [shape: f32[2,1,128], index: 4, kind: output, shape index: {}]  }
   0x1   :  { %11 = vsyncpa [#allocation4 + $0x1], 0  ;;  %s958_s15 = smov 0   ;;  %s960_s16 = smov 0  }
   0x2   :  { %s962_s17 = smov 0   ;;  %s964_s18 = smov 0  }
   0x3   :  { %s966_s19 = smov 0   ;;  %s968_s20 = smov 0  }
   0x4   :  { %s970_s21 = smov 0   ;;  %s972_s22 = smov 0  }
   0x5 LB: > { %1221 = sst [smem:[#allocation6_spill]] %s905_s17  ;;  %s628_s23 = sadd.s32 4294967295, %s925_s22   ;;  %s925_s22 = sphi %s972_s22, %s17_s22   ;;  %s921_s21 = sphi %s970_s21, %s1236_s21   ;;  %s917_s20 = sphi %s968_s20, %s1235_s20   ;;  %s913_s19 = sphi %s966_s19, %s1234_s19   ;;  %s909_s18 = sphi %s964_s18, %s1233_s18   ;;  %s905_s17 = sphi %s962_s17, %s1232_s17   ;;  %s901_s16 = sphi %s960_s16, %s1238_s16   ;;  %s897_s15 = sphi %s958_s15, %s1237_s15  }
   0x6   : > { %1222 = sst [smem:[#allocation7_spill]] %s917_s20  ;;  %s629_s24 = sadd.s32 4294967294, %s925_s22  }
   0x7   : > { %1223 = sst [smem:[#allocation8_spill]] %s921_s21  ;;  %s26_s25 = sadd.s32 1, %s917_s20 }
   0x8   : > { %p27_p0 = scmp.ge.s32.totalorder %s26_s25, 2  ;;  %s29_s26 = sadd.s32 1, %s921_s21 }
   0x9   : > { %p152_p1 = scmp.ne.s32.totalorder %s905_s17, %s901_s16  ;;  %p153_p2 = scmp.eq.s32.totalorder %s628_s23, 3 }
   0xa   : > { %s1240_s25 = smov (%p27_p0, %s26_s25), 0  ;;  %s1242_s26 = smov (!%p27_p0, %s29_s26), %s921_s21 }
   0xb   : > { %1224 = sst [smem:[#allocation9_spill]] %s1240_s25  ;;  %p1007_p3 = por %p153_p2, %p152_p1 }
   0xc   : > { %p158_p4 = scmp.ne.s32.totalorder %s901_s16, %s897_s15  ;;  %p31_p5 = scmp.ge.s32.totalorder %s1242_s26, 2 }
   0xd   : > { %p159_p6 = scmp.eq.s32.totalorder %s629_s24, 3  ;;  %p632_p7 = scmp.ge.s32.totalorder %s925_s22, 1 }
   0xe   : > { %p209_p8 = scmp.lt.s32.totalorder %s925_s22, 5  ;;  %s1244_s26 = smov (%p31_p5, %s1242_s26), 0 }
   0xf   : > { %1226 = sst [smem:[#allocation10_spill]] %s1244_s26  ;;  %p1017_p9 = por %p159_p6, %p158_p4 }
  0x10   : > { %p210_p10 = pnand %p632_p7, %p209_p8  ;;  %s139_s29 = ssub.s32 %s921_s21, %s1244_s26 }
  0x11   : > { %s142_s30 = sadd.s32 1, %s905_s17  ;;  %p140_p11 = scmp.eq.s32.totalorder %s139_s29, 0 }
  0x12   : > { %213 = sbr.rel (%p210_p10) target bundleno = 623 (0x26f), region = 36  ;;  %s633_s7 = sshll.u32 (!%p210_p10), %s909_s18, 4 }
  0x13   : > { %s1025_s5 = scalar_select %p140_p11, %s905_s17, %s142_s30  }
  0x14   : > { %p249_p12 = scmp.lt.s32.totalorder (!%p210_p10), %s913_s19, 1  ;;  %p251_p13 = scmp.lt.s32.totalorder (!%p210_p10), %s633_s7, 31 }
  0x15   : > { %1228 = sst [smem:[#allocation11_spill]] %s1025_s5  ;;  %s1229_s17 = sand.u32 (!%p210_p10), 1, %s901_s16  }
  0x16   : > { %s1055_s10 = scalar_lea.vmem (!%p210_p10), [#allocation3], %s1229_s17  ;;  %p637_p0 = scmp.ne.s32.totalorder (!%p210_p10), %s909_s18, 0 }
  0x19   : > { %s1031_s8 = scalar_select %p249_p12, %s913_s19, 1 }
  0x1a   : > { %s1246_s7 = smov (!%p251_p13, %s633_s7), 31  ;;  %271 = sbr.rel (%p637_p0) target bundleno = 33 (0x21), region = 40 }
  0x1b   : > { %s634_s9 = sshll.u32 %s1031_s8, 5  ;;  %s260_s12 = scalar_lea.vmem %s1213_s1, %s1031_s8  ;;  %vm272_vm0 = vcmask (!%p637_p0), 60416   ;;  %v927_v0 = vmov (!%p637_p0), 0.0  }
  0x1c   : > { %s254_s13 = sadd.s32 %s634_s9, %s1246_s7  ;;  %s263_s24 = scalar_lea.vmem %s1214_s2, %s1031_s8  ;;  %273 = vst.msk [vmem:[#allocation2] sm:$0xf] (!%p637_p0), %vm272_vm0, %v927_v0 }
  0x1d   : > { %s635_s29 = sshll.u32 %s254_s13, 3  ;;  %s636_s30 = sshll.u32 %s1031_s8, 2 }
  0x1e   : > { %s1046_s25 = scalar_lea.vmem %s1212_s0, %s635_s29  ;;  %s1051_s5 = scalar_lea.vmem %s1215_s3, %s636_s30 }
  0x21 PF: > { %v274_v1 = vld [vmem:[%s1046_s25] sm:$0xff]  ;;  %v291_v2 = vlaneseq  ;;  %s638_s26 = sshll.u32 %s909_s18, 7  ;;  %v928_v3 = vmov 0.0|0.0   ;;  %v275_v5 = vld [vmem:[%s1046_s25 + $0x8] sm:$0xff]  ;;  %vm929_vm1 = vmmov 0   ;;  %v930_v7 = vmov 0.0  }
  0x22   : > { %379 = vxpose.xlu0.b32.start [1/16] (narrow) %v274_v1, 8  ;;  %729 = vmatprep.subr.bf16.mxu0 %v928_v3  ;;  %v1061_v4 = vstv %s638_s26  ;;  %v1076_v12 = vld [vmem:[%s260_s12] ss:$0 sm:$0xff]  ;;  %v276_v15 = vld [vmem:[%s1046_s25 + $0x10] sm:$0xff]  ;;  %v277_v23 = vld [vmem:[%s1046_s25 + $0x18] sm:$0xff]  ;;  %p672_p1 = scmp.ne.s32.totalorder %s909_s18, 1 }
  0x23   : > { %v1064_v6 = vshrl.u32 %v291_v2, 7  ;;  %726 = vmatprep.mubr.msk.f32.mxu0 %vm929_vm1, %v930_v7  ;;  %v931_v24 = vmov 1.0|1.0   ;;  %v278_v29 = vld [vmem:[%s1046_s25 + $0x20] sm:$0xff]  ;;  %v279_v34 = vld [vmem:[%s1046_s25 + $0x28] sm:$0xff]  ;;  %v280_v39 = vld [vmem:[%s1046_s25 + $0x30] sm:$0xff] }
  0x24   : > { %v281_v44 = vld [vmem:[%s1046_s25 + $0x38] sm:$0xff]  ;;  %v282_v47 = vld [vmem:[%s1046_s25 + $0x40] sm:$0xff]  ;;  %v283_v48 = vld [vmem:[%s1046_s25 + $0x48] sm:$0xff] }
  0x25   : > { %v293_v8 = vadd.s32 8, %v1064_v6  ;;  %v310_v9 = vadd.s32 %v1061_v4, %v1064_v6  ;;  %v294_v10 = vadd.s32 16, %v1064_v6  ;;  %v295_v11 = vadd.s32 24, %v1064_v6  ;;  %v284_v49 = vld [vmem:[%s1046_s25 + $0x50] sm:$0xff]  ;;  %v285_v50 = vld [vmem:[%s1046_s25 + $0x58] sm:$0xff]  ;;  %v286_v51 = vld [vmem:[%s1046_s25 + $0x60] sm:$0xff] }
  0x26   : > { %380 = vxpose.xlu0.b32.cont [2/16] (narrow) %v275_v5, 8  ;;  %v296_v13 = vadd.s32 32, %v1064_v6  ;;  %v297_v14 = vadd.s32 40, %v1064_v6  ;;  %v298_v21 = vadd.s32 48, %v1064_v6  ;;  %v299_v22 = vadd.s32 56, %v1064_v6  ;;  %v287_v52 = vld [vmem:[%s1046_s25 + $0x68] sm:$0xff] }
  0x27   : > { %v311_v16 = vadd.s32 %v1061_v4, %v293_v8  ;;  %vm330_vm2 = vcmp.eq.s32.totalorder %v310_v9, %v1076_v12  ;;  %v312_v17 = vadd.s32 %v1061_v4, %v294_v10  ;;  %v313_v18 = vadd.s32 %v1061_v4, %v295_v11  ;;  %v288_v53 = vld [vmem:[%s1046_s25 + $0x70] sm:$0xff]  ;;  %v289_v54 = vld [vmem:[%s1046_s25 + $0x78] sm:$0xff]  ;;  %v378_v56 = vld [vmem:[#allocation2] sm:$0xf] }
  0x28   : > { %v314_v19 = vadd.s32 %v1061_v4, %v296_v13  ;;  %v315_v20 = vadd.s32 %v1061_v4, %v297_v14  ;;  %v300_v25 = vadd.s32 64, %v1064_v6  ;;  %v316_v26 = vadd.s32 %v1061_v4, %v298_v21  ;;  %v673_v60 = vld [vmem:[%s263_s24] ss:$0 sm:$0xff] (!%p672_p1) }
  0x29   : > { %vm331_vm3 = vcmp.eq.s32.totalorder %v311_v16, %v1076_v12  ;;  %vm332_vm4 = vcmp.eq.s32.totalorder %v312_v17, %v1076_v12  ;;  %vm333_vm5 = vcmp.eq.s32.totalorder %v313_v18, %v1076_v12  ;;  %v317_v27 = vadd.s32 %v1061_v4, %v299_v22  ;;  %v497_v62 = vld [vmem:[%s1051_s5] sm:$0xf] (!%p672_p1) }
  0x2a   : > { %381 = vxpose.xlu0.b32.cont [3/16] (narrow) %v276_v15, 8  ;;  %vm730_vm6 = vmpackc.low %vm331_vm3, %vm330_vm2  ;;  %vm334_vm8 = vcmp.eq.s32.totalorder %v314_v19, %v1076_v12  ;;  %vm335_vm9 = vcmp.eq.s32.totalorder %v315_v20, %v1076_v12  ;;  %v301_v28 = vadd.s32 72, %v1064_v6  ;;  %v318_v30 = vadd.s32 %v1061_v4, %v300_v25 }
  0x2b   : > { %731 = vmatpush3.bf16.msk.msra.mxu0 %vm730_vm6, %v931_v24  ;;  %vm733_vm7 = vmpackc.low %vm333_vm5, %vm332_vm4  ;;  %v302_v31 = vadd.s32 80, %v1064_v6  ;;  %vm336_vm11 = vcmp.eq.s32.totalorder %v316_v26, %v1076_v12  ;;  %vm337_vm12 = vcmp.eq.s32.totalorder %v317_v27, %v1076_v12  ;;  %v303_v33 = vadd.s32 88, %v1064_v6 }
  0x2c   : > { %732 = vmatprep.subr.bf16.mxu0 %v928_v3  ;;  %vm736_vm10 = vmpackc.low %vm335_vm9, %vm334_vm8  ;;  %v319_v32 = vadd.s32 %v1061_v4, %v301_v28  ;;  %v304_v35 = vadd.s32 96, %v1064_v6  ;;  %v305_v36 = vadd.s32 104, %v1064_v6  ;;  %vm338_vm14 = vcmp.eq.s32.totalorder %v318_v30, %v1076_v12 }
  0x2d   : > { %vm739_vm13 = vmpackc.low %vm337_vm12, %vm336_vm11  ;;  %v320_v37 = vadd.s32 %v1061_v4, %v302_v31  ;;  %v321_v38 = vadd.s32 %v1061_v4, %v303_v33  ;;  %v306_v42 = vadd.s32 112, %v1064_v6  ;;  %v307_v43 = vadd.s32 120, %v1064_v6 }
  0x2e   : > { %382 = vxpose.xlu0.b32.cont [4/16] (narrow) %v277_v23, 8  ;;  %vm339_vm15 = vcmp.eq.s32.totalorder %v319_v32, %v1076_v12  ;;  %v322_v40 = vadd.s32 %v1061_v4, %v304_v35  ;;  %v323_v41 = vadd.s32 %v1061_v4, %v305_v36  ;;  %v498_v0 = vmul.f32 (!%p672_p1), %v673_v60, %v497_v62 }
  0x2f   : > { %734 = vmatpush3.bf16.msk.msra.mxu0 %vm733_vm7, %v931_v24  ;;  %vm742_vm0 = vmpackc.low %vm339_vm15, %vm338_vm14  ;;  %vm340_vm1 = vcmp.eq.s32.totalorder %v320_v37, %v1076_v12  ;;  %vm341_vm2 = vcmp.eq.s32.totalorder %v321_v38, %v1076_v12  ;;  %v324_v45 = vadd.s32 %v1061_v4, %v306_v42  ;;  %v325_v46 = vadd.s32 %v1061_v4, %v307_v43 }
  0x30   : > { %735 = vmatprep.subr.bf16.mxu0 %v928_v3  ;;  %vm745_vm3 = vmpackc.low %vm341_vm2, %vm340_vm1  ;;  %vm342_vm4 = vcmp.eq.s32.totalorder %v322_v40, %v1076_v12  ;;  %vm343_vm5 = vcmp.eq.s32.totalorder %v323_v41, %v1076_v12 }
  0x31   : > { %vm748_vm6 = vmpackc.low %vm343_vm5, %vm342_vm4  ;;  %vm344_vm7 = vcmp.eq.s32.totalorder %v324_v45, %v1076_v12  ;;  %vm345_vm8 = vcmp.eq.s32.totalorder %v325_v46, %v1076_v12 }
  0x32   : > { %383 = vxpose.xlu0.b32.cont [5/16] (narrow) %v278_v29, 8  ;;  %vm751_vm9 = vmpackc.low %vm345_vm8, %vm344_vm7 }
  0x33   : > { %737 = vmatpush3.bf16.msk.msra.mxu0 %vm736_vm10, %v931_v24  ;;  %vm482_vm10 = vcmask 60416  }
  0x34   : > { %738 = vmatprep.subr.bf16.mxu0 %v928_v3 }
  0x36   : > { %384 = vxpose.xlu0.b32.cont [6/16] (narrow) %v279_v34, 8 }
  0x37   : > { %740 = vmatpush3.bf16.msk.msra.mxu0 %vm739_vm13, %v931_v24 }
  0x38   : > { %741 = vmatprep.subr.bf16.mxu0 %v928_v3 }
  0x3a   : > { %385 = vxpose.xlu0.b32.cont [7/16] (narrow) %v280_v39, 8 }
  0x3b   : > { %743 = vmatpush3.bf16.msk.msra.mxu0 %vm742_vm0, %v931_v24 }
  0x3c   : > { %744 = vmatprep.subr.bf16.mxu0 %v928_v3 }
  0x3e   : > { %386 = vxpose.xlu0.b32.cont [8/16] (narrow) %v281_v44, 8 }
  0x3f   : > { %746 = vmatpush3.bf16.msk.msra.mxu0 %vm745_vm3, %v931_v24 }
  0x40   : > { %747 = vmatprep.subr.bf16.mxu0 %v928_v3 }
  0x42   : > { %387 = vxpose.xlu0.b32.cont [9/16] (narrow) %v282_v47, 8 }
  0x43   : > { %749 = vmatpush3.bf16.msk.msra.mxu0 %vm748_vm6, %v931_v24 }
  0x44   : > { %750 = vmatprep.subr.bf16.mxu0 %v928_v3 }
  0x46   : > { %388 = vxpose.xlu0.b32.cont [10/16] (narrow) %v283_v48, 8 }
  0x47   : > { %752 = vmatpush3.bf16.msk.msra.mxu0 %vm751_vm9, %v931_v24 }
  0x4a   : > { %389 = vxpose.xlu0.b32.cont [11/16] (narrow) %v284_v49, 8 }
  0x4e   : > { %390 = vxpose.xlu0.b32.cont [12/16] (narrow) %v285_v50, 8 }
  0x52   : > { %391 = vxpose.xlu0.b32.cont [13/16] (narrow) %v286_v51, 8 }
  0x56   : > { %392 = vxpose.xlu0.b32.cont [14/16] (narrow) %v287_v52, 8 }
  0x5a   : > { %393 = vxpose.xlu0.b32.cont [15/16] (narrow) %v288_v53, 8 }
  0x5e   : > { %394 = vxpose.xlu0.b32.end [16/16] (narrow) %v289_v54, 8 }
  0xa2   : > { %v395_v55 = vpop.trf.xlu0 }
  0xa3   : > { %727 = vmatmul.mubr.f32.vlgmr.msra.gmra.mrb[0].mxu0 %v395_v55 }
 0x173   : > { %487 = sbr.rel (%p672_p1) target bundleno = 598 (0x256), region = 44 }
 0x176   : > { %v477_v57 = vpop.f32.mrb[0].mxu0 }
 0x177   : > { %v481_v58 = vadd.f32 %v477_v57, %v378_v56  ;;  %v728_v59 = vpop.f32.mrb[1].mxu0 }
 0x179   : > { %483 = vst.msk [vmem:[#allocation2] sm:$0xf] %vm482_vm10, %v481_v58 }
 0x180   : > { %v489_v61 = vld [vmem:[#allocation2] sm:$0xf] }
 0x181   : > { %v496_v63 = vmul.f32 %v673_v60, %v489_v61 }
 0x183   : > { %v499_v1 = vsub.f32 %v496_v63, %v498_v0 }
 0x185   : > { %v500_v2 = vand.u32 2147483647, %v499_v1 }
 0x187   : > { %v501_v3 = vsel %vm482_vm10, %v500_v2, 0.0 }
 0x188   : > { %502 = vadd.xlane.f32.xlu0 %v501_v3 }
 0x215   : > { %v503_v4 = vpop.xlane.xlu0 %502 }
 0x216   : > { %v504_v5 = vrot.slane %v503_v4, 4 }
 0x218   : > { %v505_v6 = vadd.f32 %v504_v5, %v503_v4 }
 0x21a   : > { %v506_v7 = vrot.slane %v505_v6, 2 }
 0x21c   : > { %v507_v8 = vadd.f32 %v506_v7, %v505_v6 }
 0x21e   : > { %v508_v9 = vrot.slane %v507_v8, 1 }
 0x220   : > { %v509_v10 = vadd.f32 %v508_v9, %v507_v8 }
 0x222   : > { %753 = vpush %v509_v10 }
 0x253   : > { %s754_s18 = spop %753 }
 0x254   : > { %v511_v11 = vstv %s754_s18 }
 0x255   : > { %512 = vst [vmem:[%s1055_s10] sm:$0x1] %v511_v11 }
 0x256 PF: > { %s674_s25 = sshll.u32 %s913_s19, 4  ;;  %s526_s9 = sshll.u32 %s1055_s10, 4  ;;  %s527_s9 = int_to_ptr.vmem [resolvable:$true] %s526_s9 }
 0x257   : > { %s1162_s8 = scalar_lea.hbm %s1216_s4, %s674_s25  ;;  %s1230_s11 = sand.u32 1, %s901_s16  }
 0x258   : > { %s514_s12 = scalar_lea.sflag [#allocation4], %s1230_s11  ;;  %s831_s13 = scalar_lea.vmem %s527_s9, 16 }
 0x259   : > { %p832_p2 = scmp.ne.s32.totalorder %s527_s9, %s831_s13  ;;  %s932_s14 = smov [#allocation3]  }
 0x25a   : > { %s835_s23 = sshll.u32 %s932_s14, 4  ;;  %s836_s23 = int_to_ptr.vmem [resolvable:$false] %s835_s23 }
 0x25b   : > { %p833_p4 = pnand %p832_p2, %p1007_p3  ;;  %s837_s24 = scalar_lea.vmem %s836_s23, 32 }
 0x25c   : > { %p838_p6 = scmp.lt.s32.totalorder %s527_s9, %s836_s23  ;;  %p839_p7 = scmp.lt.s32.totalorder %s837_s24, %s831_s13 }
 0x25d   : > { %p834_p5 = pneg %p833_p4 }
 0x25e   : > { %p840_p8 = por %p839_p7, %p838_p6 }
 0x260   : > { %p841_p10 = pnand %p840_p8, %p834_p5 }
 0x262   : > { %844 = shalt.err (!%p841_p10)
}
 0x263   : > { %s845_s19 = scalar_lea.hbm %s1162_s8, 16  ;;  %s849_s10 = scalar_lea.hbm %s1216_s4, 32 }
 0x264   : > { %p846_p11 = scmp.ne.s32.totalorder %s1162_s8, %s845_s19  ;;  %p850_p0 = scmp.lt.u32.totalorder %s1162_s8, %s1216_s4 }
 0x265   : > { %p851_p1 = scmp.lt.u32.totalorder %s849_s10, %s845_s19  ;;  %p853_p4 = scmp.lt.u32.totalorder %s845_s19, %s1162_s8 }
 0x266   : > { %p847_p12 = pnand %p846_p11, %p1007_p3 }
 0x267   : > { %p852_p2 = por %p851_p1, %p850_p0 }
 0x268   : > { %p848_p13 = pneg %p847_p12 }
 0x269   : > { %p854_p5 = por %p853_p4, %p852_p2 }
 0x26b   : > { %p855_p6 = pnand %p854_p5, %p848_p13 }
 0x26d   : > { %858 = shalt.err (!%p855_p6)
}
 0x26e   : > { %755 = dma.vmem_to_hbm [thread:$0]  (%p1007_p3), %s527_s9, 16, %s1162_s8, %s514_s12  }
 0x26f PF: > { %p761_p7 = scmp.ge.s32.totalorder %s925_s22, 2  ;;  %s538_s20 = sand.u32 1, %s897_s15  }
 0x270   : > { %s539_s21 = scalar_lea.sflag [#allocation4], %s538_s20 }
 0x271   : > { %p758_p8 = pnand %p761_p7, %p1017_p9 }
 0x273   : > { %892 = dma.done.wait (!%p758_p8), %s539_s21, 16  }
 0x274   : > { %894 = vsyncadd (!%p758_p8), %s539_s21, 4294967280  ;;  %s17_s22 = sadd.s32 1, %s925_s22   ;;  %s1231_s6 = sld [smem:[#allocation6_spill]] }
 0x275   : > { %p14_p10 = scmp.ge.s32.totalorder %s17_s22, 6   ;;  %s1232_s17 = sld [smem:[#allocation11_spill]] }
 0x276   : > { %s1233_s18 = sld [smem:[#allocation7_spill]]  ;;  %s1234_s19 = sld [smem:[#allocation8_spill]] }
 0x277   : > { %s1235_s20 = sld [smem:[#allocation9_spill]]  ;;  %s1236_s21 = sld [smem:[#allocation10_spill]] }
 0x278   : > { %s1237_s15 = smov %s901_s16  ;;  %16 = sbr.rel (!%p14_p10) target bundleno = 5 (0x5), region = 88 }
 0x27a   : > { %s1238_s16 = smov %s1231_s6 }
 0x27f   :  { %543 = vsyncpa [#allocation4], 1 }
 0x280   :  { %545 = vsyncpa [#allocation4 + $0x1], 1 }

</bundles_post_ra>
